<compile_context>
chip_gen: v7x
topology: tpu7x:2x2x1
jax: 0.10.0
libtpu: 0.0.40
codegen_flags: <defaults>
</compile_context>

<pallas_src>
import functools

import jax
import jax.numpy as jnp
from jax.experimental import pallas as pl
from jax.experimental.pallas import tpu as pltpu


def _round_up(x, m):
    return ((x + m - 1) // m) * m


def _probe_pipeline_mode():
    """Check that BlockSpec(pipeline_mode=pl.Buffered(1)) is constructible."""
    try:
        pl.BlockSpec((1, 1), lambda i: (0, 0), pipeline_mode=pl.Buffered(1))
        return True
    except Exception:
        return False


_HAS_PIPELINE_MODE = _probe_pipeline_mode()


def adapter_kernel(x_ref, ln_g_ref, ln_b_ref,
                   w_down_ref, b_down_ref, w_up_ref, b_up_ref,
                   *rest, scale, eps, add_residual, separate_residual):
    if separate_residual:
        res_ref, out_ref = rest
    else:
        (out_ref,) = rest

    x = x_ref[...].astype(jnp.float32)

    # --- LayerNorm over last dim ('in' option), f32 statistics ---
    mean = jnp.mean(x, axis=-1, keepdims=True)
    xc = x - mean
    var = jnp.mean(xc * xc, axis=-1, keepdims=True)
    xn = xc * jax.lax.rsqrt(var + eps) * ln_g_ref[...].astype(jnp.float32) \
         + ln_b_ref[...].astype(jnp.float32)

    # --- down_proj + ReLU: MXU operands in weight dtype, f32 accumulation ---
    w_down = w_down_ref[...]
    down = jnp.dot(xn.astype(w_down.dtype), w_down,
                   preferred_element_type=jnp.float32)
    down = jnp.maximum(down + b_down_ref[...].astype(jnp.float32), 0.0)
    # dropout(p=0.0) is an identity.
    # TODO(synk): training-mode dropout with p>0 is not implemented in-kernel.

    # --- up_proj, scale, residual ---
    w_up = w_up_ref[...]
    up = jnp.dot(down.astype(w_up.dtype), w_up,
                 preferred_element_type=jnp.float32)
    up = up + b_up_ref[...].astype(jnp.float32)
    if scale != 1.0:
        up = up * scale
    if add_residual:
        # Re-read the residual tile late (the VMEM input buffer is live anyway)
        # so no extra f32 slab stays live across the two matmuls.
        res = res_ref[...] if separate_residual else x_ref[...]
        up = up + res.astype(jnp.float32)

    out_ref[...] = up.astype(out_ref.dtype)


def adapter_forward(x, params, *, scale=1.0, eps=1e-5,
                    add_residual=True, residual=None,
                    max_block_rows=256):
    """x: [..., D]. params: dict of adapter weights (see init_adapter_params)."""
    orig_shape = x.shape
    D = orig_shape[-1]
    x2d = x.reshape(-1, D)
    N = x2d.shape[0]
    B = params["w_down"].shape[1]

    # PyTorch semantics: an explicit residual is only consumed when
    # add_residual=True; otherwise the adapter output is returned as-is.
    separate_residual = (residual is not None) and add_residual
    res2d = residual.reshape(-1, D) if separate_residual else None

    itemsize = jnp.dtype(x.dtype).itemsize
    row_align = 8 if itemsize >= 4 else 16

    # --- zero-pad the bottleneck to a lane-dense multiple of 128 (exact) ---
    B_pad = _round_up(B, 128)
    w_down = params["w_down"]
    w_up = params["w_up"]
    b_down = params["b_down"].reshape(1, B)
    if B_pad != B:
        w_down = jnp.pad(w_down, ((0, 0), (0, B_pad - B)))
        w_up = jnp.pad(w_up, ((0, B_pad - B), (0, 0)))
        b_down = jnp.pad(b_down, ((0, 0), (0, B_pad - B)))
    ln_g = params["ln_gamma"].reshape(1, D)
    ln_b = params["ln_beta"].reshape(1, D)
    b_up = params["b_up"].reshape(1, D)

    def _nbytes(a):
        return a.size * jnp.dtype(a.dtype).itemsize

    raw_weight_bytes = (_nbytes(w_down) + _nbytes(w_up) + _nbytes(b_down)
                        + _nbytes(b_up) + _nbytes(ln_g) + _nbytes(ln_b))
    # Single-buffer the grid-invariant operands only when they are big enough
    # for the VMEM saving to matter.
    use_single_buffer = _HAS_PIPELINE_MODE and raw_weight_bytes >= (1 << 20)
    weight_bytes = raw_weight_bytes * (1 if use_single_buffer else 2)

    # --- VMEM accounting: double-buffered row streams + live f32 temps ---
    n_row_streams = 2 + (1 if separate_residual else 0)   # x in + out (+ res)
    per_row_bytes = (2 * n_row_streams * D * itemsize      # pipelined I/O tiles
                     + (3 * D + B_pad) * 4)                # live f32 intermediates

    headroom = 4 << 20
    try:
        vmem_cap = int(pltpu.get_tpu_info().vmem_capacity_bytes)
    except Exception:
        vmem_cap = 64 << 20                                # conservative (v7x)
    gen_limit = (40 << 20) if vmem_cap <= (64 << 20) else (48 << 20)

    budget = max(gen_limit - headroom - weight_bytes, row_align * per_row_bytes)
    block_rows = min(max_block_rows, budget // per_row_bytes)
    block_rows = max(row_align, (block_rows // row_align) * row_align)
    block_rows = min(block_rows, _round_up(N, row_align))
    # Target >= 4 grid steps (>= 2 per TensorCore on v7x) so DMA overlaps compute.
    if N > row_align:
        block_rows = min(block_rows,
                         max(row_align, _round_up(pl.cdiv(N, 4), row_align)))

    grid = (pl.cdiv(N, block_rows),)   # partial last block handled by Pallas

    footprint = weight_bytes + block_rows * per_row_bytes
    vmem_limit = int(min(gen_limit, max(32 << 20, footprint + headroom)))

    def _const_spec(shape):
        if use_single_buffer:
            return pl.BlockSpec(shape, lambda i: (0, 0),
                                pipeline_mode=pl.Buffered(1))
        return pl.BlockSpec(shape, lambda i: (0, 0))

    row_spec = pl.BlockSpec((block_rows, D), lambda i: (i, 0))

    in_specs = [
        row_spec,                   # x tile (also the residual when residual is x)
        _const_spec((1, D)),        # ln gamma
        _const_spec((1, D)),        # ln beta
        _const_spec((D, B_pad)),    # W_down  (stored (in, out) == PyTorch W_down^T)
        _const_spec((1, B_pad)),    # b_down
        _const_spec((B_pad, D)),    # W_up    (stored (in, out) == PyTorch W_up^T)
        _const_spec((1, D)),        # b_up
    ]
    inputs = [x2d, ln_g, ln_b, w_down, b_down, w_up, b_up]
    if separate_residual:
        in_specs.append(row_spec)
        inputs.append(res2d)

    kernel = functools.partial(
        adapter_kernel, scale=float(scale), eps=float(eps),
        add_residual=bool(add_residual),
        separate_residual=bool(separate_residual))

    out2d = pl.pallas_call(
        kernel,
        out_shape=jax.ShapeDtypeStruct((N, D), x.dtype),
        grid_spec=pltpu.PrefetchScalarGridSpec(
            num_scalar_prefetch=0,
            grid=grid,
            in_specs=in_specs,
            out_specs=row_spec,
        ),
        compiler_params=pltpu.CompilerParams(
            dimension_semantics=("parallel",),
            vmem_limit_bytes=vmem_limit,
        ),
    )(*inputs)

    return out2d.reshape(orig_shape)


def init_adapter_params(key, d_model, bottleneck, dtype=jnp.float32):
    """'bert' init: Linear weights ~ N(0, 0.02), biases 0, LN weight=1 bias=0.
    Weights stored as (in, out) so the kernel computes x @ W directly
    (== PyTorch x @ W.T)."""
    k1, k2 = jax.random.split(key)
    return {
        "ln_gamma": jnp.ones((d_model,), dtype),
        "ln_beta": jnp.zeros((d_model,), dtype),
        "w_down": (0.02 * jax.random.normal(k1, (d_model, bottleneck))).astype(dtype),
        "b_down": jnp.zeros((bottleneck,), dtype),
        "w_up": (0.02 * jax.random.normal(k2, (bottleneck, d_model))).astype(dtype),
        "b_up": jnp.zeros((d_model,), dtype),
    }


def adapter_ref(x, params, *, scale=1.0, eps=1e-5, residual=None, add_residual=True):
    """Pure-JAX reference for validation."""
    residual = x if residual is None else residual
    mean = jnp.mean(x, axis=-1, keepdims=True)
    var = jnp.mean((x - mean) ** 2, axis=-1, keepdims=True)
    xn = (x - mean) * jax.lax.rsqrt(var + eps) * params["ln_gamma"] + params["ln_beta"]
    down = jnp.maximum(xn @ params["w_down"] + params["b_down"], 0.0)
    up = (down @ params["w_up"] + params["b_up"]) * scale
    return up + residual if add_residual else up


if __name__ == "__main__":
    key = jax.random.PRNGKey(0)
    kx, kp, kr, kx2 = jax.random.split(key, 4)

    batch, seq, d_model, bottleneck = 2, 8, 32, 16
    x = jax.random.normal(kx, (batch, seq, d_model), dtype=jnp.float32)
    params = init_adapter_params(kp, d_model, bottleneck)

    # 1) default: residual = x, add_residual = True
    out = adapter_forward(x, params, scale=1.0)
    jax.block_until_ready(out)
    ref = adapter_ref(x, params)
    assert jnp.allclose(out, ref, atol=1e-5, rtol=1e-5), "mismatch (default path)"

    # 2) no residual add
    out_nr = adapter_forward(x, params, add_residual=False)
    ref_nr = adapter_ref(x, params, add_residual=False)
    assert jnp.allclose(out_nr, ref_nr, atol=1e-5, rtol=1e-5), "mismatch (no residual)"

    # 3) explicit residual + non-unit scale, row count NOT a multiple of the
    #    row tile (exercises the partial-last-block path: no wrapper pad/slice)
    x_odd = jax.random.normal(kx2, (3, 5, d_model), dtype=jnp.float32)
    res_odd = jax.random.normal(kr, (3, 5, d_model), dtype=jnp.float32)
    out_r = adapter_forward(x_odd, params, scale=0.5, residual=res_odd)
    ref_r = adapter_ref(x_odd, params, scale=0.5, residual=res_odd)
    assert jnp.allclose(out_r, ref_r, atol=1e-5, rtol=1e-5), "mismatch (explicit residual)"

    # 4) bf16 weights/activations (MXU-friendly path), f32 reference, loose tol
    params_bf16 = jax.tree_util.tree_map(lambda a: a.astype(jnp.bfloat16), params)
    x_bf16 = x.astype(jnp.bfloat16)
    out_bf = adapter_forward(x_bf16, params_bf16)
    params_bf16_as_f32 = jax.tree_util.tree_map(lambda a: a.astype(jnp.float32),
                                                params_bf16)
    ref_bf = adapter_ref(x_bf16.astype(jnp.float32), params_bf16_as_f32)
    assert jnp.allclose(out_bf.astype(jnp.float32), ref_bf,
                        atol=1e-1, rtol=5e-2), "mismatch (bf16 path)"

    print("KERNEL_OK")
</pallas_src>

<mosaic_0001>
module attributes {stable_mosaic.version = 11 : i64} {
  func.func @adapter_kernel(%arg0: i32, %arg1: memref<8x32xf32, #tpu.memory_space<vmem>>, %arg2: memref<1x32xf32, #tpu.memory_space<vmem>>, %arg3: memref<1x32xf32, #tpu.memory_space<vmem>>, %arg4: memref<32x128xf32, #tpu.memory_space<vmem>>, %arg5: memref<1x128xf32, #tpu.memory_space<vmem>>, %arg6: memref<128x32xf32, #tpu.memory_space<vmem>>, %arg7: memref<1x32xf32, #tpu.memory_space<vmem>>, %arg8: memref<8x32xf32, #tpu.memory_space<vmem>>) attributes {dimension_semantics = [#tpu.dimension_semantics<parallel>], iteration_bounds = array<i64: 2>, scalar_prefetch = 0 : i64, scratch_operands = 0 : i64, tpu.core_type = #tpu.core_type<tc>, window_params = [{transform_indices = @transform_0, window_bounds = array<i64: 8, 32>}, {pipeline_mode = #tpu.pipeline_mode<synchronous>, transform_indices = @transform_1, window_bounds = array<i64: 1, 32>}, {pipeline_mode = #tpu.pipeline_mode<synchronous>, transform_indices = @transform_2, window_bounds = array<i64: 1, 32>}, {pipeline_mode = #tpu.pipeline_mode<synchronous>, transform_indices = @transform_3, window_bounds = array<i64: 32, 128>}, {pipeline_mode = #tpu.pipeline_mode<synchronous>, transform_indices = @transform_4, window_bounds = array<i64: 1, 128>}, {pipeline_mode = #tpu.pipeline_mode<synchronous>, transform_indices = @transform_5, window_bounds = array<i64: 128, 32>}, {pipeline_mode = #tpu.pipeline_mode<synchronous>, transform_indices = @transform_6, window_bounds = array<i64: 1, 32>}, {transform_indices = @transform_7, window_bounds = array<i64: 8, 32>}]} {
    %c0 = arith.constant 0 : index
    %c0_0 = arith.constant 0 : index
    %0 = vector.load %arg1[%c0, %c0_0] : memref<8x32xf32, #tpu.memory_space<vmem>>, vector<8x32xf32>
    %cst = arith.constant dense<0.000000e+00> : vector<8xf32>
    %1 = vector.multi_reduction <add>, %0, %cst [1] : vector<8x32xf32> to vector<8xf32>
    %2 = vector.shape_cast %1 : vector<8xf32> to vector<8x1xf32>
    %cst_1 = arith.constant 3.200000e+01 : f32
    %3 = vector.broadcast %cst_1 : f32 to vector<8x1xf32>
    %4 = arith.divf %2, %3 : vector<8x1xf32>
    %5 = vector.broadcast %4 : vector<8x1xf32> to vector<8x32xf32>
    %6 = arith.subf %0, %5 : vector<8x32xf32>
    %7 = arith.mulf %6, %6 : vector<8x32xf32>
    %cst_2 = arith.constant dense<0.000000e+00> : vector<8xf32>
    %8 = vector.multi_reduction <add>, %7, %cst_2 [1] : vector<8x32xf32> to vector<8xf32>
    %9 = vector.shape_cast %8 : vector<8xf32> to vector<8x1xf32>
    %cst_3 = arith.constant 3.200000e+01 : f32
    %10 = vector.broadcast %cst_3 : f32 to vector<8x1xf32>
    %11 = arith.divf %9, %10 : vector<8x1xf32>
    %cst_4 = arith.constant 9.99999974E-6 : f32
    %12 = vector.broadcast %cst_4 : f32 to vector<8x1xf32>
    %13 = arith.addf %11, %12 : vector<8x1xf32>
    %14 = math.rsqrt %13 : vector<8x1xf32>
    %15 = vector.broadcast %14 : vector<8x1xf32> to vector<8x32xf32>
    %16 = arith.mulf %6, %15 : vector<8x32xf32>
    %c0_5 = arith.constant 0 : index
    %c0_6 = arith.constant 0 : index
    %17 = vector.load %arg2[%c0_5, %c0_6] : memref<1x32xf32, #tpu.memory_space<vmem>>, vector<1x32xf32>
    %18 = vector.broadcast %17 : vector<1x32xf32> to vector<8x32xf32>
    %19 = arith.mulf %16, %18 : vector<8x32xf32>
    %c0_7 = arith.constant 0 : index
    %c0_8 = arith.constant 0 : index
    %20 = vector.load %arg3[%c0_7, %c0_8] : memref<1x32xf32, #tpu.memory_space<vmem>>, vector<1x32xf32>
    %21 = vector.broadcast %20 : vector<1x32xf32> to vector<8x32xf32>
    %22 = arith.addf %19, %21 : vector<8x32xf32>
    %c0_9 = arith.constant 0 : index
    %c0_10 = arith.constant 0 : index
    %23 = vector.load %arg4[%c0_9, %c0_10] : memref<32x128xf32, #tpu.memory_space<vmem>>, vector<32x128xf32>
    %cst_11 = arith.constant dense<0.000000e+00> : vector<8x128xf32>
    %24 = tpu.matmul %22, %23, %cst_11 {dimension_numbers = #tpu.dot_dimension_numbers<[1], [0], [0], [1], [0, 0, 1, 1], [], []>} : vector<8x32xf32>, vector<32x128xf32>, vector<8x128xf32> -> vector<8x128xf32>
    %c0_12 = arith.constant 0 : index
    %c0_13 = arith.constant 0 : index
    %25 = vector.load %arg5[%c0_12, %c0_13] : memref<1x128xf32, #tpu.memory_space<vmem>>, vector<1x128xf32>
    %26 = vector.broadcast %25 : vector<1x128xf32> to vector<8x128xf32>
    %27 = arith.addf %24, %26 : vector<8x128xf32>
    %cst_14 = arith.constant 0.000000e+00 : f32
    %28 = vector.broadcast %cst_14 : f32 to vector<8x128xf32>
    %29 = arith.maximumf %27, %28 : vector<8x128xf32>
    %c0_15 = arith.constant 0 : index
    %c0_16 = arith.constant 0 : index
    %30 = vector.load %arg6[%c0_15, %c0_16] : memref<128x32xf32, #tpu.memory_space<vmem>>, vector<128x32xf32>
    %cst_17 = arith.constant dense<0.000000e+00> : vector<8x32xf32>
    %31 = tpu.matmul %29, %30, %cst_17 {dimension_numbers = #tpu.dot_dimension_numbers<[1], [0], [0], [1], [0, 0, 1, 1], [], []>} : vector<8x128xf32>, vector<128x32xf32>, vector<8x32xf32> -> vector<8x32xf32>
    %c0_18 = arith.constant 0 : index
    %c0_19 = arith.constant 0 : index
    %32 = vector.load %arg7[%c0_18, %c0_19] : memref<1x32xf32, #tpu.memory_space<vmem>>, vector<1x32xf32>
    %33 = vector.broadcast %32 : vector<1x32xf32> to vector<8x32xf32>
    %34 = arith.addf %31, %33 : vector<8x32xf32>
    %c0_20 = arith.constant 0 : index
    %c0_21 = arith.constant 0 : index
    %35 = vector.load %arg1[%c0_20, %c0_21] : memref<8x32xf32, #tpu.memory_space<vmem>>, vector<8x32xf32>
    %36 = arith.addf %34, %35 : vector<8x32xf32>
    %c0_22 = arith.constant 0 : index
    %c0_23 = arith.constant 0 : index
    %37 = vector.load %arg8[%c0_22, %c0_23] : memref<8x32xf32, #tpu.memory_space<vmem>>, vector<8x32xf32>
    tpu.vector_store %arg8[%c0_22, %c0_23], %36 {strides = array<i32>} : memref<8x32xf32, #tpu.memory_space<vmem>>, vector<8x32xf32>,
    return
  }
  func.func @transform_0(%arg0: i32) -> (i32, i32) {
    %c0_i32 = arith.constant 0 : i32
    %c0_i32_0 = arith.constant 0 : i32
    return %arg0, %c0_i32 : i32, i32
  }
  func.func @transform_1(%arg0: i32) -> (i32, i32) {
    %c0_i32 = arith.constant 0 : i32
    %c0_i32_0 = arith.constant 0 : i32
    %c0_i32_1 = arith.constant 0 : i32
    return %c0_i32, %c0_i32_0 : i32, i32
  }
  func.func @transform_2(%arg0: i32) -> (i32, i32) {
    %c0_i32 = arith.constant 0 : i32
    %c0_i32_0 = arith.constant 0 : i32
    %c0_i32_1 = arith.constant 0 : i32
    return %c0_i32, %c0_i32_0 : i32, i32
  }
  func.func @transform_3(%arg0: i32) -> (i32, i32) {
    %c0_i32 = arith.constant 0 : i32
    %c0_i32_0 = arith.constant 0 : i32
    %c0_i32_1 = arith.constant 0 : i32
    return %c0_i32, %c0_i32_0 : i32, i32
  }
  func.func @transform_4(%arg0: i32) -> (i32, i32) {
    %c0_i32 = arith.constant 0 : i32
    %c0_i32_0 = arith.constant 0 : i32
    %c0_i32_1 = arith.constant 0 : i32
    return %c0_i32, %c0_i32_0 : i32, i32
  }
  func.func @transform_5(%arg0: i32) -> (i32, i32) {
    %c0_i32 = arith.constant 0 : i32
    %c0_i32_0 = arith.constant 0 : i32
    %c0_i32_1 = arith.constant 0 : i32
    return %c0_i32, %c0_i32_0 : i32, i32
  }
  func.func @transform_6(%arg0: i32) -> (i32, i32) {
    %c0_i32 = arith.constant 0 : i32
    %c0_i32_0 = arith.constant 0 : i32
    %c0_i32_1 = arith.constant 0 : i32
    return %c0_i32, %c0_i32_0 : i32, i32
  }
  func.func @transform_7(%arg0: i32) -> (i32, i32) {
    %c0_i32 = arith.constant 0 : i32
    %c0_i32_0 = arith.constant 0 : i32
    return %arg0, %c0_i32 : i32, i32
  }
}

</mosaic_0001>

<bundles_post_ra>
// kernel: tpu_custom_call.1
= control target key start
LH: loop header
LB: loop body
LE: loop exit
PB: predicated region body
PF: predicated region fallthrough
CT: control target
= control target key end

     0   :  { %12 = vsyncpa [#allocation3], 0  ;;  %s1005_s0 = inlined_call_operand.vmem [shape: f32[16,32], index: 0, kind: input, shape index: {}]   ;;  %s1006_s1 = inlined_call_operand.vmem [shape: f32[1,32], index: 1, kind: input, shape index: {}]   ;;  %s1007_s2 = inlined_call_operand.vmem [shape: f32[1,32], index: 2, kind: input, shape index: {}]   ;;  %s1008_s3 = inlined_call_operand.vmem [shape: f32[32,128], index: 3, kind: input, shape index: {}]   ;;  %s1009_s4 = inlined_call_operand.vmem [shape: f32[1,128], index: 4, kind: input, shape index: {}]   ;;  %s1010_s5 = inlined_call_operand.vmem [shape: f32[128,32], index: 5, kind: input, shape index: {}]   ;;  %s1011_s6 = inlined_call_operand.vmem [shape: f32[1,32], index: 6, kind: input, shape index: {}]   ;;  %s1012_s7 = inlined_call_operand.hbm [shape: f32[16,32], index: 7, kind: output, shape index: {}]  }
   0x1   :  { %14 = vsyncpa [#allocation3 + $0x1], 0  ;;  %s824_s24 = smov 0   ;;  %s826_s25 = smov 0  }
   0x2   :  { %s828_s26 = smov 0   ;;  %s830_s27 = smov 0  }
   0x3 LB: > { %s845_s28 = sadd.s32 4294967295, %s778_s27   ;;  %s559_s29 = sadd.s32 4294967294, %s778_s27   ;;  %s778_s27 = sphi %s830_s27, %s1018_s27   ;;  %s774_s26 = sphi %s828_s26, %s1017_s26   ;;  %s770_s25 = sphi %s826_s25, %s1016_s25   ;;  %s766_s24 = sphi %s824_s24, %s1015_s24  }
   0x4   : > { %s849_s30 = sadd.s32 1, %s778_s27   ;;  %s179_s8 = sadd.s32 1, %s774_s26 }
   0x5   : > { %s176_s9 = ssub.s32 %s778_s27, %s849_s30  ;;  %p189_p0 = scmp.ne.s32.totalorder %s774_s26, %s770_s25 }
   0x6   : > { %p177_p1 = scmp.eq.s32.totalorder %s176_s9, 0  ;;  %p190_p2 = scmp.eq.s32.totalorder %s845_s28, 1 }
   0x7   : > { %p195_p3 = scmp.ne.s32.totalorder %s770_s25, %s766_s24  ;;  %p196_p4 = scmp.eq.s32.totalorder %s559_s29, 1 }
   0x8   : > { %s860_s10 = scalar_select %p177_p1, %s774_s26, %s179_s8  }
   0x9   : > { %p862_p5 = por %p190_p2, %p189_p0  ;;  %p866_p6 = por %p196_p4, %p195_p3 }
   0xa   : > { %p562_p7 = scmp.ge.s32.totalorder %s778_s27, 1  ;;  %p239_p8 = scmp.lt.s32.totalorder %s778_s27, 3 }
   0xc   : > { %p240_p9 = pnand %p562_p7, %p239_p8 }
   0xd   : > { %p270_p10 = scmp.lt.s32.totalorder (!%p240_p9), %s845_s28, 1  ;;  %vm275_vm0 = vcmask (!%p240_p9), 261120   ;;  %v306_v7 = vld [vmem:[%s1008_s3] sm:$0xff] (!%p240_p9)  ;;  %v307_v8 = vld [vmem:[%s1008_s3 + $0x8] sm:$0xff] (!%p240_p9)  ;;  %v308_v9 = vld [vmem:[%s1008_s3 + $0x10] sm:$0xff] (!%p240_p9)  ;;  %v780_v10 = vmov (!%p240_p9), 0.0|0.0  }
   0xe   : > { %243 = sbr.rel (%p240_p9) target bundleno = 785 (0x311), region = 48  ;;  %642 = vmatprep.subr.bf16.mxu0 (!%p240_p9), %v780_v10  ;;  %v643_v11 = vpack.c.bf16 (!%p240_p9), %v307_v8, %v306_v7  ;;  %v309_v12 = vld [vmem:[%s1008_s3 + $0x18] sm:$0xff] (!%p240_p9)  ;;  %vm781_vm1 = vmmov (!%p240_p9), 0   ;;  %v782_v13 = vmov (!%p240_p9), 0.0   ;;  %648 = vmatprep.subr.bf16.mxu1 (!%p240_p9), %v780_v10  ;;  %v391_v15 = vld [vmem:[%s1010_s5] sm:$0xff] (!%p240_p9)  ;;  %v392_v16 = vld [vmem:[%s1010_s5 + $0x8] sm:$0xff] (!%p240_p9) }
   0xf   : > { %604 = vmatprep.mubr.msk.f32.mxu0 (!%p240_p9), %vm781_vm1, %v782_v13  ;;  %639 = vmatprep.mubr.msk.f32.mxu1 (!%p240_p9), %vm781_vm1, %v782_v13  ;;  %v646_v14 = vpack.c.bf16 (!%p240_p9), %v309_v12, %v308_v9  ;;  %v393_v17 = vld [vmem:[%s1010_s5 + $0x10] sm:$0xff] (!%p240_p9)  ;;  %v649_v18 = vpack.c.bf16 (!%p240_p9), %v392_v16, %v391_v15  ;;  %v394_v19 = vld [vmem:[%s1010_s5 + $0x18] sm:$0xff] (!%p240_p9)  ;;  %v395_v21 = vld [vmem:[%s1010_s5 + $0x20] sm:$0xff] (!%p240_p9)  ;;  %s267_s22 = sand.u32 (!%p240_p9), 1, %s770_s25   ;;  %s571_s9 = sshll.u32 (!%p240_p9), %s845_s28, 7 }
  0x10   : > { %644 = vmatpush3.bf16.msra.mxu0 (!%p240_p9), %v643_v11  ;;  %v652_v20 = vpack.c.bf16 (!%p240_p9), %v394_v19, %v393_v17  ;;  %v396_v22 = vld [vmem:[%s1010_s5 + $0x28] sm:$0xff] (!%p240_p9)  ;;  %v397_v24 = vld [vmem:[%s1010_s5 + $0x30] sm:$0xff] (!%p240_p9)  ;;  %v398_v25 = vld [vmem:[%s1010_s5 + $0x38] sm:$0xff] (!%p240_p9)  ;;  %s563_s23 = sshll.u32 (!%p240_p9), %s267_s22, 3  ;;  %s487_s18 = scalar_lea.sflag (!%p240_p9), [#allocation3], %s267_s22 }
  0x11   : > { %645 = vmatprep.subr.bf16.mxu0 (!%p240_p9), %v780_v10  ;;  %650 = vmatpush3.bf16.msra.mxu1 (!%p240_p9), %v649_v18  ;;  %v655_v23 = vpack.c.bf16 (!%p240_p9), %v396_v22, %v395_v21  ;;  %v658_v26 = vpack.c.bf16 (!%p240_p9), %v398_v25, %v397_v24  ;;  %v399_v27 = vld [vmem:[%s1010_s5 + $0x40] sm:$0xff] (!%p240_p9)  ;;  %v400_v28 = vld [vmem:[%s1010_s5 + $0x48] sm:$0xff] (!%p240_p9)  ;;  %v401_v30 = vld [vmem:[%s1010_s5 + $0x50] sm:$0xff] (!%p240_p9)  ;;  %s783_s19 = smov (!%p240_p9), [#allocation2]  }
  0x12   : > { %651 = vmatprep.subr.bf16.mxu1 (!%p240_p9), %v780_v10  ;;  %v661_v29 = vpack.c.bf16 (!%p240_p9), %v400_v28, %v399_v27  ;;  %v402_v31 = vld [vmem:[%s1010_s5 + $0x58] sm:$0xff] (!%p240_p9)  ;;  %v403_v33 = vld [vmem:[%s1010_s5 + $0x60] sm:$0xff] (!%p240_p9)  ;;  %v404_v34 = vld [vmem:[%s1010_s5 + $0x68] sm:$0xff] (!%p240_p9)  ;;  %s720_s20 = sshll.u32 (!%p240_p9), %s783_s19, 4  ;;  %s721_s20 = int_to_ptr.vmem [resolvable:$false] %s720_s20 }
  0x13   : > { %v664_v32 = vpack.c.bf16 (!%p240_p9), %v402_v31, %v401_v30  ;;  %v667_v35 = vpack.c.bf16 (!%p240_p9), %v404_v34, %v403_v33  ;;  %v565_v40 = vld [vmem:[%s1006_s1] ss:$0 sm:$0xff] (!%p240_p9)  ;;  %v405_v45 = vld [vmem:[%s1010_s5 + $0x70] sm:$0xff] (!%p240_p9)  ;;  %v406_v46 = vld [vmem:[%s1010_s5 + $0x78] sm:$0xff] (!%p240_p9)  ;;  %s722_s21 = scalar_lea.vmem (!%p240_p9), %s721_s20, 256 }
  0x14   : > { %647 = vmatpush3.bf16.msra.mxu0 (!%p240_p9), %v646_v14  ;;  %v566_v42 = vld [vmem:[%s1007_s2] ss:$0 sm:$0xff] (!%p240_p9)  ;;  %v670_v47 = vpack.c.bf16 (!%p240_p9), %v406_v46, %v405_v45 }
  0x15   : > { %s271_s13 = scalar_select %p270_p10, %s845_s28, 1  ;;  %653 = vmatpush3.bf16.msra.mxu1 %v652_v20  ;;  %v567_v48 = vld [vmem:[%s1009_s4] ss:$0 sm:$0xff] }
  0x16   : > { %654 = vmatprep.subr.bf16.mxu1 %v780_v10  ;;  %v569_v53 = vld [vmem:[%s1011_s6] ss:$0 sm:$0xff] }
  0x17   : > { %s564_s14 = sshll.u32 %s271_s13, 3  ;;  %s269_s13 = scalar_lea.vmem [#allocation2], %s563_s23 }
  0x18   : > { %s273_s17 = scalar_lea.vmem %s1005_s0, %s564_s14  ;;  %s500_s14 = sshll.u32 %s269_s13, 4  ;;  %s964_s14 = int_to_ptr.vmem [resolvable:$true] %s500_s14 }
  0x19   : > { %v877_v0 = vld [vmem:[%s273_s17] sm:$0xff]  ;;  %656 = vmatpush3.bf16.msra.mxu1 %v655_v23  ;;  %s962_s17 = scalar_lea.hbm %s1012_s7, %s571_s9  ;;  %s716_s28 = scalar_lea.vmem %s964_s14, 128 }
  0x1a   : > { %v276_v1 = vsel %vm275_vm0, %v877_v0, 0.0  ;;  %657 = vmatprep.subr.bf16.mxu1 %v780_v10  ;;  %p717_p11 = scmp.ne.s32.totalorder %s964_s14, %s716_s28  ;;  %p723_p0 = scmp.lt.s32.totalorder %s964_s14, %s721_s20 }
  0x1b   : > { %277 = vadd.xlane.f32.xlu0 %v276_v1  ;;  %p724_p1 = scmp.lt.s32.totalorder %s722_s21, %s716_s28 }
  0x1c   : > { %p718_p12 = pnand %p717_p11, %p862_p5 }
  0x1d   : > { %659 = vmatpush3.bf16.msra.mxu1 %v658_v26  ;;  %p725_p2 = por %p724_p1, %p723_p0 }
  0x1e   : > { %660 = vmatprep.subr.bf16.mxu1 %v780_v10  ;;  %p719_p13 = pneg %p718_p12 }
  0x20   : > { %p726_p3 = pnand %p725_p2, %p719_p13 }
  0x21   : > { %662 = vmatpush3.bf16.msra.mxu1 %v661_v29 }
  0x22   : > { %663 = vmatprep.subr.bf16.mxu1 %v780_v10 }
  0x25   : > { %665 = vmatpush3.bf16.msra.mxu1 %v664_v32 }
  0x26   : > { %666 = vmatprep.subr.bf16.mxu1 %v780_v10 }
  0x29   : > { %668 = vmatpush3.bf16.msra.mxu1 %v667_v35 }
  0x2a   : > { %669 = vmatprep.subr.bf16.mxu1 %v780_v10 }
  0x2d   : > { %671 = vmatpush3.bf16.msra.mxu1 %v670_v47 }
  0xa8   : > { %v278_v2 = vpop.xlane.xlu0 %277 }
  0xa9   : > { %v280_v3 = vmul.f32 0.03125, %v278_v2 }
  0xab   : > { %v281_v4 = vsub.f32 %v877_v0, %v280_v3 }
  0xad   : > { %v282_v5 = vmul.f32 %v281_v4, %v281_v4 }
  0xaf   : > { %v283_v6 = vsel %vm275_vm0, %v282_v5, 0.0 }
  0xb0   : > { %284 = vadd.xlane.f32.xlu0 %v283_v6 }
 0x13d   : > { %v285_v36 = vpop.xlane.xlu0 %284 }
 0x13e   : > { %v286_v37 = vmul.f32 0.03125, %v285_v36 }
 0x140   : > { %v287_v38 = vadd.f32 1e-05, %v286_v37 }
 0x142   : > { %714 = vrsqrt.f32 %v287_v38 }
 0x14c   : > { %v715_v39 = vpop.eup %714 }
 0x14d   : > { %v289_v41 = vmul.f32 %v715_v39, %v281_v4 }
 0x14f   : > { %v297_v43 = vmul.f32 %v565_v40, %v289_v41 }
 0x151   : > { %v305_v44 = vadd.f32 %v566_v42, %v297_v43 }
 0x153   : > { %605 = vmatmul.mubr.msk.f32.vlgmr.msra.gmra.mrb[0].mxu0 %vm275_vm0, %v305_v44 }
 0x226   : > { %v386_v49 = vpop.f32.mrb[0].mxu0 }
 0x227   : > { %v387_v50 = vadd.f32 %v567_v48, %v386_v49  ;;  %v606_v51 = vpop.f32.mrb[1].mxu0 }
 0x229   : > { %v390_v52 = vmax.f32 %v387_v50, 0.0 }
 0x22b   : > { %640 = vmatmul.mubr.f32.vlgmr.msra.gmra.mrb[0].mxu1 %v390_v52 }
 0x2fe   : > { %v480_v54 = vpop.f32.mrb[0].mxu1 }
 0x2ff   : > { %v481_v55 = vadd.f32 %v569_v53, %v480_v54  ;;  %v641_v56 = vpop.f32.mrb[1].mxu1 }
 0x301   : > { %v484_v57 = vadd.f32 %v481_v55, %v877_v0 }
 0x303   : > { %485 = vst.msk [vmem:[%s269_s13] sm:$0xff] %vm275_vm0, %v484_v57 }
 0x304   : > { %729 = shalt.err (!%p726_p3)
}
 0x305   : > { %s730_s22 = scalar_lea.hbm %s962_s17, 128  ;;  %s734_s8 = scalar_lea.hbm %s1012_s7, 256 }
 0x306   : > { %p731_p4 = scmp.ne.s32.totalorder %s962_s17, %s730_s22  ;;  %p735_p9 = scmp.lt.u32.totalorder %s962_s17, %s1012_s7 }
 0x307   : > { %p736_p10 = scmp.lt.u32.totalorder %s734_s8, %s730_s22  ;;  %p738_p12 = scmp.lt.u32.totalorder %s730_s22, %s962_s17 }
 0x308   : > { %p732_p7 = pnand %p731_p4, %p862_p5 }
 0x309   : > { %p737_p11 = por %p736_p10, %p735_p9 }
 0x30a   : > { %p733_p8 = pneg %p732_p7 }
 0x30b   : > { %p739_p13 = por %p738_p12, %p737_p11 }
 0x30d   : > { %p740_p0 = pnand %p739_p13, %p733_p8 }
 0x30f   : > { %743 = shalt.err (!%p740_p0)
}
 0x310   : > { %672 = dma.vmem_to_hbm [thread:$0]  (%p862_p5), %s964_s14, 128, %s962_s17, %s487_s18  }
 0x311 PF: > { %p678_p1 = scmp.ge.s32.totalorder %s778_s27, 2  ;;  %s512_s15 = sand.u32 1, %s766_s24  }
 0x312   : > { %s513_s16 = scalar_lea.sflag [#allocation3], %s512_s15 }
 0x313   : > { %p675_p2 = pnand %p678_p1, %p866_p6 }
 0x315   : > { %761 = dma.done.wait (!%p675_p2), %s513_s16, 128  }
 0x316   : > { %763 = vsyncadd (!%p675_p2), %s513_s16, 4294967168  ;;  %p17_p3 = scmp.ge.s32.totalorder %s849_s30, 4   ;;  %s1015_s24 = smov %s770_s25 }
 0x317   : > { %s1016_s25 = smov %s774_s26  ;;  %s1017_s26 = smov %s860_s10 }
 0x318   : > { %s1018_s27 = smov %s849_s30  ;;  %19 = sbr.rel (!%p17_p3) target bundleno = 3 (0x3), region = 83 }
 0x31f   :  { %518 = vsyncpa [#allocation3], 1 }
 0x320   :  { %520 = vsyncpa [#allocation3 + $0x1], 1 }

</bundles_post_ra>
